<compile_context>
chip_gen: v6e
topology: v6e:2x2x1
jax: 0.10.0
libtpu: 0.0.40
codegen_flags: <defaults>
</compile_context>

<pallas_src>
import functools

import jax
import jax.numpy as jnp
from jax.experimental import pallas as pl
from jax.experimental.pallas import tpu as pltpu

SIGMA = 0.1


def _round_up(n, m):
    return ((n + m - 1) // m) * m


def _gaussian_noise_net_kernel(x_ref, w_ref, b_ref, n_ref, o_ref, *, sigma,
                               valid_c):
    # ---- base: logits = x @ W + b (MXU, f32 accumulate) ----
    logits = jnp.dot(x_ref[...], w_ref[...],
                     preferred_element_type=jnp.float32) + b_ref[...]

    # ---- mask padded class columns so they don't pollute the softmax ----
    padded_c = logits.shape[-1]
    if valid_c != padded_c:
        col = jax.lax.broadcasted_iota(jnp.int32, logits.shape, dimension=1)
        logits = jnp.where(col < valid_c, logits, -jnp.inf)

    # ---- softmax over dim=1 (= last dim of (B, C)) ----
    m = jnp.max(logits, axis=-1, keepdims=True)
    e = jnp.exp(logits - m)
    denom = jnp.sum(e, axis=-1, keepdims=True)
    # (pl.reciprocal(denom, approx=True) would move this to the EUP slot on
    #  TPU, but plain division is kept for interpret-mode portability.)
    p = e / denom

    # ---- GaussianNoise: y = p + sigma * N(0, 1) ----
    o_ref[...] = (p + sigma * n_ref[...]).astype(o_ref.dtype)


def gaussian_noise_net(x, w, b, noise, *, sigma=SIGMA, block_b=None):
    """x: (B, H) f32, w: (H, C) f32, b: (1, C) f32, noise: (B, C) f32 std-normal.

    Returns softmax(x @ w + b, axis=1) + sigma * noise, shape (B, C) f32.
    """
    B, H = x.shape
    C = w.shape[1]

    # Lane-dense / MXU-friendly padding: K (=H) and N (=C) to multiples of 128.
    Hp = _round_up(H, 128)
    Cp = _round_up(C, 128)

    # Batch tile: multiple of 8 sublanes, capped so double-buffered tiles fit
    # comfortably even in v7x's 64 MiB VMEM.
    if block_b is None:
        block_b = min(512, _round_up(B, 8))
    Bp = _round_up(B, block_b)

    x_p = jnp.pad(x, ((0, Bp - B), (0, Hp - H)))
    w_p = jnp.pad(w, ((0, Hp - H), (0, Cp - C)))
    b_p = jnp.pad(b, ((0, 0), (0, Cp - C)))
    n_p = jnp.pad(noise, ((0, Bp - B), (0, Cp - C)))

    kernel = functools.partial(_gaussian_noise_net_kernel, sigma=sigma,
                               valid_c=C)

    out = pl.pallas_call(
        kernel,
        out_shape=jax.ShapeDtypeStruct((Bp, Cp), jnp.float32),
        grid=(Bp // block_b,),
        in_specs=[
            pl.BlockSpec((block_b, Hp), lambda i: (i, 0)),   # x tile (streamed)
            pl.BlockSpec((Hp, Cp), lambda i: (0, 0)),        # W (VMEM-resident)
            pl.BlockSpec((1, Cp), lambda i: (0, 0)),         # bias (resident)
            pl.BlockSpec((block_b, Cp), lambda i: (i, 0)),   # noise tile
        ],
        out_specs=pl.BlockSpec((block_b, Cp), lambda i: (i, 0)),
        compiler_params=pltpu.CompilerParams(
            dimension_semantics=("parallel",),
            vmem_limit_bytes=48 * 1024 * 1024,
        ),
    )(x_p, w_p, b_p, n_p)

    return out[:B, :C]


if __name__ == "__main__":
    key = jax.random.PRNGKey(0)
    kx, kw, kb, kn = jax.random.split(key, 4)

    batch, hidden, classes = 8, 32, 16

    # deterministic synthetic inputs / parameters (no checkpoint load)
    x = jax.random.normal(kx, (batch, hidden), dtype=jnp.float32)
    w = (jax.random.normal(kw, (hidden, classes), dtype=jnp.float32)
         * (1.0 / jnp.sqrt(hidden)))
    b = jax.random.normal(kb, (1, classes), dtype=jnp.float32) * 0.01
    # torch.randn_like(softmax_out) equivalent
    noise = jax.random.normal(kn, (batch, classes), dtype=jnp.float32)

    y = gaussian_noise_net(x, w, b, noise, sigma=SIGMA)
    y = jax.block_until_ready(y)

    # reference: softmax over dim=1, then add sigma * noise
    ref = jax.nn.softmax(x @ w + b, axis=1) + SIGMA * noise

    assert y.shape == (batch, classes)
    assert bool(jnp.all(jnp.isfinite(y)))
    assert bool(jnp.allclose(y, ref, atol=1e-5, rtol=1e-5))

    print("KERNEL_OK")
</pallas_src>

<mosaic_0001>
module attributes {stable_mosaic.version = 11 : i64} {
  func.func @_gaussian_noise_net_kernel(%arg0: i32, %arg1: memref<8x128xf32, #tpu.memory_space<vmem>>, %arg2: memref<128x128xf32, #tpu.memory_space<vmem>>, %arg3: memref<1x128xf32, #tpu.memory_space<vmem>>, %arg4: memref<8x128xf32, #tpu.memory_space<vmem>>, %arg5: memref<8x128xf32, #tpu.memory_space<vmem>>) attributes {dimension_semantics = [#tpu.dimension_semantics<parallel>], iteration_bounds = array<i64: 1>, scalar_prefetch = 0 : i64, scratch_operands = 0 : i64, tpu.core_type = #tpu.core_type<tc>, window_params = [{transform_indices = @transform_0, window_bounds = array<i64: 8, 128>}, {pipeline_mode = #tpu.pipeline_mode<synchronous>, transform_indices = @transform_1, window_bounds = array<i64: 128, 128>}, {pipeline_mode = #tpu.pipeline_mode<synchronous>, transform_indices = @transform_2, window_bounds = array<i64: 1, 128>}, {transform_indices = @transform_3, window_bounds = array<i64: 8, 128>}, {transform_indices = @transform_4, window_bounds = array<i64: 8, 128>}]} {
    %c0 = arith.constant 0 : index
    %c0_0 = arith.constant 0 : index
    %0 = vector.load %arg1[%c0, %c0_0] : memref<8x128xf32, #tpu.memory_space<vmem>>, vector<8x128xf32>
    %c0_1 = arith.constant 0 : index
    %c0_2 = arith.constant 0 : index
    %1 = vector.load %arg2[%c0_1, %c0_2] : memref<128x128xf32, #tpu.memory_space<vmem>>, vector<128x128xf32>
    %cst = arith.constant dense<0.000000e+00> : vector<8x128xf32>
    %2 = tpu.matmul %0, %1, %cst {dimension_numbers = #tpu.dot_dimension_numbers<[1], [0], [0], [1], [0, 0, 1, 1], [], []>} : vector<8x128xf32>, vector<128x128xf32>, vector<8x128xf32> -> vector<8x128xf32>
    %c0_3 = arith.constant 0 : index
    %c0_4 = arith.constant 0 : index
    %3 = vector.load %arg3[%c0_3, %c0_4] : memref<1x128xf32, #tpu.memory_space<vmem>>, vector<1x128xf32>
    %4 = vector.broadcast %3 : vector<1x128xf32> to vector<8x128xf32>
    %5 = arith.addf %2, %4 : vector<8x128xf32>
    %6 = tpu.iota {dimensions = array<i32: 1>} : vector<8x128xi32>
    %c16_i32 = arith.constant 16 : i32
    %7 = vector.broadcast %c16_i32 : i32 to vector<8x128xi32>
    %8 = arith.cmpi slt, %6, %7 : vector<8x128xi32>
    %cst_5 = arith.constant 0xFF800000 : f32
    %9 = vector.broadcast %cst_5 : f32 to vector<8x128xf32>
    %10 = arith.select %8, %5, %9 : vector<8x128xi1>, vector<8x128xf32>
    %cst_6 = arith.constant dense<0xFF800000> : vector<8xf32>
    %11 = vector.multi_reduction <maximumf>, %10, %cst_6 [1] : vector<8x128xf32> to vector<8xf32>
    %12 = vector.shape_cast %11 : vector<8xf32> to vector<8x1xf32>
    %13 = vector.broadcast %12 : vector<8x1xf32> to vector<8x128xf32>
    %14 = arith.subf %10, %13 : vector<8x128xf32>
    %15 = math.exp %14 : vector<8x128xf32>
    %cst_7 = arith.constant dense<0.000000e+00> : vector<8xf32>
    %16 = vector.multi_reduction <add>, %15, %cst_7 [1] : vector<8x128xf32> to vector<8xf32>
    %17 = vector.shape_cast %16 : vector<8xf32> to vector<8x1xf32>
    %18 = vector.broadcast %17 : vector<8x1xf32> to vector<8x128xf32>
    %19 = arith.divf %15, %18 : vector<8x128xf32>
    %c0_8 = arith.constant 0 : index
    %c0_9 = arith.constant 0 : index
    %20 = vector.load %arg4[%c0_8, %c0_9] : memref<8x128xf32, #tpu.memory_space<vmem>>, vector<8x128xf32>
    %cst_10 = arith.constant 1.000000e-01 : f32
    %21 = vector.broadcast %cst_10 : f32 to vector<8x128xf32>
    %22 = arith.mulf %21, %20 : vector<8x128xf32>
    %23 = arith.addf %19, %22 : vector<8x128xf32>
    %c0_11 = arith.constant 0 : index
    %c0_12 = arith.constant 0 : index
    %24 = vector.load %arg5[%c0_11, %c0_12] : memref<8x128xf32, #tpu.memory_space<vmem>>, vector<8x128xf32>
    tpu.vector_store %arg5[%c0_11, %c0_12], %23 {strides = array<i32>} : memref<8x128xf32, #tpu.memory_space<vmem>>, vector<8x128xf32>,
    return
  }
  func.func @transform_0(%arg0: i32) -> (i32, i32) {
    %c0_i32 = arith.constant 0 : i32
    %c0_i32_0 = arith.constant 0 : i32
    return %arg0, %c0_i32 : i32, i32
  }
  func.func @transform_1(%arg0: i32) -> (i32, i32) {
    %c0_i32 = arith.constant 0 : i32
    %c0_i32_0 = arith.constant 0 : i32
    %c0_i32_1 = arith.constant 0 : i32
    return %c0_i32, %c0_i32_0 : i32, i32
  }
  func.func @transform_2(%arg0: i32) -> (i32, i32) {
    %c0_i32 = arith.constant 0 : i32
    %c0_i32_0 = arith.constant 0 : i32
    %c0_i32_1 = arith.constant 0 : i32
    return %c0_i32, %c0_i32_0 : i32, i32
  }
  func.func @transform_3(%arg0: i32) -> (i32, i32) {
    %c0_i32 = arith.constant 0 : i32
    %c0_i32_0 = arith.constant 0 : i32
    return %arg0, %c0_i32 : i32, i32
  }
  func.func @transform_4(%arg0: i32) -> (i32, i32) {
    %c0_i32 = arith.constant 0 : i32
    %c0_i32_0 = arith.constant 0 : i32
    return %arg0, %c0_i32 : i32, i32
  }
}

</mosaic_0001>

<bundles_post_ra>
// kernel: tpu_custom_call.1
= control target key start
LH: loop header
LB: loop body
LE: loop exit
PB: predicated region body
PF: predicated region fallthrough
CT: control target
= control target key end

     0   :  { %9 = vsyncpa [#allocation3], 0  ;;  %s381_s0 = inlined_call_operand.hbm [shape: f32[8,128], index: 0, kind: input, shape index: {}]   ;;  %s382_s1 = inlined_call_operand.hbm [shape: f32[128,128], index: 1, kind: input, shape index: {}]   ;;  %s383_s2 = inlined_call_operand.vmem [shape: f32[1,128], index: 2, kind: input, shape index: {}]   ;;  %s384_s3 = inlined_call_operand.hbm [shape: f32[8,128], index: 3, kind: input, shape index: {}]   ;;  %s385_s4 = inlined_call_operand.hbm [shape: f32[8,128], index: 4, kind: output, shape index: {}]  }
   0x1   :  { %10 = vsyncpa [#allocation6], 0 }
   0x2   :  { %11 = vsyncpa [#allocation4], 0  ;;  %s333_s15 = smov [#allocation5]  }
   0x3   :  { %s27_s16 = sshll.u32 %s333_s15, 4  ;;  %s28_s16 = int_to_ptr.vmem [resolvable:$true] %s27_s16 }
   0x4   :  { %s255_s17 = scalar_lea.vmem %s28_s16, 2048  ;;  %p260_p1 = scmp.lt.s32.totalorder %s28_s16, %s28_s16 }
   0x5   :  { %p256_p0 = scmp.ne.s32.totalorder %s28_s16, %s255_s17  ;;  %p261_p2 = scmp.lt.s32.totalorder %s255_s17, %s255_s17 }
   0x7   :  { %p262_p3 = por %p261_p2, %p260_p1 }
   0x9   :  { %p263_p4 = pnand %p262_p3, %p256_p0 }
   0xb   :  { %266 = shalt.err (!%p263_p4)
}
   0xc   :  { %s334_s18 = smov 128   ;;  %s335_s19 = smov 8  }
   0xd   :  { %33 = dma.hbm_to_vmem [thread:$0]  %s382_s1, 2048, %s28_s16, [#allocation6], %s334_s18, %s334_s18, %s335_s19  }
   0xe   :  { %s336_s22 = smov [#allocation2]   ;;  %s337_s24 = smov [#allocation7]  }
   0xf   :  { %s18_s23 = sshll.u32 %s336_s22, 4  ;;  %s42_s25 = sshll.u32 %s337_s24, 4  ;;  %s19_s23 = int_to_ptr.vmem [resolvable:$true] %s18_s23  ;;  %s43_s25 = int_to_ptr.vmem [resolvable:$true] %s42_s25 }
  0x10   :  { %s275_s26 = scalar_lea.vmem %s19_s23, 128  ;;  %p280_p6 = scmp.lt.s32.totalorder %s19_s23, %s19_s23 }
  0x11   :  { %p276_p5 = scmp.ne.s32.totalorder %s19_s23, %s275_s26  ;;  %p281_p7 = scmp.lt.s32.totalorder %s275_s26, %s275_s26 }
  0x13   :  { %p282_p8 = por %p281_p7, %p280_p6 }
  0x15   :  { %p283_p9 = pnand %p282_p8, %p276_p5 }
  0x17   :  { %286 = shalt.err (!%p283_p9)
}
  0x18   :  { %21 = dma.hbm_to_vmem [thread:$0]  %s381_s0, 128, %s19_s23, [#allocation3]  }
  0x19   :  { %s295_s29 = scalar_lea.vmem %s43_s25, 128  ;;  %p300_p11 = scmp.lt.s32.totalorder %s43_s25, %s43_s25 }
  0x1a   :  { %p296_p10 = scmp.ne.s32.totalorder %s43_s25, %s295_s29  ;;  %p301_p12 = scmp.lt.s32.totalorder %s295_s29, %s295_s29 }
  0x1c   :  { %p302_p13 = por %p301_p12, %p300_p11 }
  0x1e   :  { %p303_p0 = pnand %p302_p13, %p296_p10 }
  0x20   :  { %306 = shalt.err (!%p303_p0)
}
  0x21   :  { %45 = dma.hbm_to_vmem [thread:$0]  %s384_s3, 128, %s43_s25, [#allocation6]  }
  0x22   :  { %327 = dma.done.wait [#allocation3], 128  }
  0x23   :  { %328 = vsyncadd [#allocation3], 4294967168 }
  0x24   :  { %329 = dma.done.wait [#allocation6], 2176  }
  0x25   :  { %330 = vsyncadd [#allocation6], 4294965120  ;;  %v338_v0 = vmov 0.0   ;;  %vm339_vm0 = vmmov 0   ;;  %v71_v1 = vld [vmem:[#allocation5 + $0x78] sm:$0xff]  ;;  %v70_v2 = vld [vmem:[#allocation5 + $0x70] sm:$0xff]  ;;  %v149_v18 = vlaneseq }
  0x26   :  { %200 = vmatprep.subr.mxu0 %v338_v0  ;;  %232 = vmatprep.mubr.msk.f32.mxu0 %vm339_vm0, %v338_v0  ;;  %v69_v3 = vld [vmem:[#allocation5 + $0x68] sm:$0xff]  ;;  %v68_v4 = vld [vmem:[#allocation5 + $0x60] sm:$0xff]  ;;  %v67_v5 = vld [vmem:[#allocation5 + $0x58] sm:$0xff]  ;;  %s340_s5 = smov [#allocation8]  }
  0x27   :  { %201 = vmatpush3.msra.mxu0 %v71_v1  ;;  %v66_v6 = vld [vmem:[#allocation5 + $0x50] sm:$0xff]  ;;  %v65_v7 = vld [vmem:[#allocation5 + $0x48] sm:$0xff]  ;;  %v64_v8 = vld [vmem:[#allocation5 + $0x40] sm:$0xff]  ;;  %v150_v19 = vand.u32 127, %v149_v18  ;;  %s172_s6 = sshll.u32 %s340_s5, 4  ;;  %s173_s6 = int_to_ptr.vmem [resolvable:$true] %s172_s6 }
  0x28   :  { %202 = vmatprep.subr.mxu0 %v338_v0  ;;  %v63_v9 = vld [vmem:[#allocation5 + $0x38] sm:$0xff]  ;;  %v62_v10 = vld [vmem:[#allocation5 + $0x30] sm:$0xff]  ;;  %v61_v11 = vld [vmem:[#allocation5 + $0x28] sm:$0xff]  ;;  %p312_p2 = scmp.lt.s32.totalorder %s173_s6, %s173_s6 }
  0x29   :  { %203 = vmatpush3.msra.mxu0 %v70_v2  ;;  %v60_v12 = vld [vmem:[#allocation5 + $0x20] sm:$0xff]  ;;  %v59_v13 = vld [vmem:[#allocation5 + $0x18] sm:$0xff]  ;;  %v58_v14 = vld [vmem:[#allocation5 + $0x10] sm:$0xff]  ;;  %vm151_vm1 = vcmp.lt.s32.totalorder %v150_v19, 16 }
  0x2a   :  { %204 = vmatprep.subr.mxu0 %v338_v0  ;;  %v57_v15 = vld [vmem:[#allocation5 + $0x8] sm:$0xff]  ;;  %v56_v16 = vld [vmem:[#allocation5] sm:$0xff]  ;;  %v55_v17 = vld [vmem:[#allocation2] sm:$0xff] }
  0x2b   :  { %205 = vmatpush3.msra.mxu0 %v69_v3  ;;  %v182_v20 = vld [vmem:[%s383_s2] ss:$0 sm:$0xff]  ;;  %v162_v30 = vld [vmem:[#allocation7] sm:$0xff]  ;;  %s307_s2 = scalar_lea.vmem %s173_s6, 128 }
  0x2c   :  { %206 = vmatprep.subr.mxu0 %v338_v0  ;;  %v163_v31 = vmul.f32 0.1, %v162_v30  ;;  %p308_p1 = scmp.ne.s32.totalorder %s173_s6, %s307_s2  ;;  %p313_p3 = scmp.lt.s32.totalorder %s307_s2, %s307_s2 }
  0x2d   :  { %207 = vmatpush3.msra.mxu0 %v68_v4 }
  0x2e   :  { %208 = vmatprep.subr.mxu0 %v338_v0  ;;  %p314_p4 = por %p313_p3, %p312_p2 }
  0x2f   :  { %209 = vmatpush3.msra.mxu0 %v67_v5 }
  0x30   :  { %210 = vmatprep.subr.mxu0 %v338_v0  ;;  %p315_p5 = pnand %p314_p4, %p308_p1 }
  0x31   :  { %211 = vmatpush3.msra.mxu0 %v66_v6 }
  0x32   :  { %212 = vmatprep.subr.mxu0 %v338_v0 }
  0x33   :  { %213 = vmatpush3.msra.mxu0 %v65_v7 }
  0x34   :  { %214 = vmatprep.subr.mxu0 %v338_v0 }
  0x35   :  { %215 = vmatpush3.msra.mxu0 %v64_v8 }
  0x36   :  { %216 = vmatprep.subr.mxu0 %v338_v0 }
  0x37   :  { %217 = vmatpush3.msra.mxu0 %v63_v9 }
  0x38   :  { %218 = vmatprep.subr.mxu0 %v338_v0 }
  0x39   :  { %219 = vmatpush3.msra.mxu0 %v62_v10 }
  0x3a   :  { %220 = vmatprep.subr.mxu0 %v338_v0 }
  0x3b   :  { %221 = vmatpush3.msra.mxu0 %v61_v11 }
  0x3c   :  { %222 = vmatprep.subr.mxu0 %v338_v0 }
  0x3d   :  { %223 = vmatpush3.msra.mxu0 %v60_v12 }
  0x3e   :  { %224 = vmatprep.subr.mxu0 %v338_v0 }
  0x3f   :  { %225 = vmatpush3.msra.mxu0 %v59_v13 }
  0x40   :  { %226 = vmatprep.subr.mxu0 %v338_v0 }
  0x41   :  { %227 = vmatpush3.msra.mxu0 %v58_v14 }
  0x42   :  { %228 = vmatprep.subr.mxu0 %v338_v0 }
  0x43   :  { %229 = vmatpush3.msra.mxu0 %v57_v15 }
  0x44   :  { %230 = vmatprep.subr.mxu0 %v338_v0 }
  0x45   :  { %231 = vmatpush3.msra.mxu0 %v56_v16 }
  0x46   :  { %233 = vmatmul.mubr.f32.vlgmr.msra.gmra.mxu0 %v55_v17 }
 0x106   :  { %v145_v21 = vpop.f32.mrf.mxu0 }
 0x107   :  { %v146_v22 = vadd.f32 %v182_v20, %v145_v21 }
 0x108   :  { %v234_v23 = vpop.f32.mrf.mxu0 }
 0x109   :  { %v152_v24 = vsel %vm151_vm1, %v146_v22, -inf }
 0x10a   :  { %153 = vmax.xlane.f32.xlu0 %v152_v24 }
 0x193   :  { %v154_v25 = vpop.xlane.xlu0 %153 }
 0x194   :  { %v155_v26 = vsub.f32 %v152_v24, %v154_v25 }
 0x196   :  { %v156_v27 = vmul.f32 1.442695, %v155_v26 }
 0x198   :  { %243 = vpow2.f32 %v156_v27 }
 0x1a5   :  { %v244_v28 = vpop.eup %243 }
 0x1a6   :  { %158 = vadd.xlane.f32.xlu0 %v244_v28 }
 0x22f   :  { %v159_v29 = vpop.xlane.xlu0 %158 }
 0x230   :  { %245 = vrcp.f32 %v159_v29 }
 0x23d   :  { %v246_v32 = vpop.eup %245 }
 0x23e   :  { %v161_v33 = vmul.f32 %v246_v32, %v244_v28 }
 0x240   :  { %v164_v34 = vadd.f32 %v163_v31, %v161_v33 }
 0x242   :  { %165 = vst [vmem:[#allocation8] sm:$0xff] %v164_v34 }
 0x243   :  { %318 = shalt.err (!%p315_p5)
}
 0x244   :  { %175 = dma.vmem_to_hbm [thread:$0]  %s173_s6, 128, %s385_s4, [#allocation4]  }
 0x245   :  { %331 = dma.done.wait [#allocation4], 128  }
 0x246   :  { %332 = vsyncadd [#allocation4], 4294967168 }
 0x247   :  { %179 = vsyncpa [#allocation3], 1 }
 0x248   :  { %180 = vsyncpa [#allocation6], 1 }
 0x249   :  { %181 = vsyncpa [#allocation4], 1 }

</bundles_post_ra>
